<compile_context>
chip_gen: v5e
topology: v5e:2x2
jax: 0.10.0
libtpu: 0.0.40
codegen_flags: <defaults>
</compile_context>

<pallas_src>
import jax
import jax.numpy as jnp
from jax.experimental import pallas as pl
from jax.experimental.pallas import tpu as pltpu

_BN_EPS = 1e-5
_LANE = 128


def _round_up(x, m):
    return (x + m - 1) // m * m


# ----------------------------- fused Pallas kernel -----------------------------

def _make_fused_mlp_kernel(fan_outs, n_pad):
    """Kernel for `len(fan_outs)` (Linear+BN+ReLU) blocks plus a final Linear.

    Ref order: x, W_0..W_{n-1} (bf16, (in,out)), W_out (bf16, (in, n_pad)),
               vec (f32, (2n+1, V)) = [gamma_0, beta_0, ..., b_out_padded], out.
    """
    n_hidden = len(fan_outs)

    def kernel(*refs):
        x_ref = refs[0]
        w_refs = refs[1:1 + n_hidden]
        w_out_ref = refs[1 + n_hidden]
        vec_ref = refs[2 + n_hidden]
        o_ref = refs[3 + n_hidden]

        h = x_ref[...].astype(jnp.float32)
        for i in range(n_hidden):
            f = fan_outs[i]
            # Native bf16 x bf16 MXU matmul, f32 accumulate (full-rate path).
            y = jnp.dot(h.astype(jnp.bfloat16), w_refs[i][...],
                        preferred_element_type=jnp.float32)
            # Hidden Linear bias omitted: exactly cancelled by BN mean subtraction.
            # BatchNorm1d (training mode), single-pass batch moments.
            mean = jnp.mean(y, axis=0, keepdims=True)
            mean_sq = jnp.mean(y * y, axis=0, keepdims=True)
            var = jnp.maximum(mean_sq - mean * mean, 0.0)     # clamp cancellation
            gamma = vec_ref[2 * i:2 * i + 1, :f]              # (1, f) static slice
            beta = vec_ref[2 * i + 1:2 * i + 2, :f]
            # Fold BN into one scale/shift: 2 VPU ops per element, rsqrt on EUP.
            scale = gamma * jax.lax.rsqrt(var + _BN_EPS)
            shift = beta - mean * scale
            h = jnp.maximum(y * scale + shift, 0.0)           # BN + ReLU

        # Final classifier: lane-dense (batch, n_pad) slab -> unmasked stores.
        y = jnp.dot(h.astype(jnp.bfloat16), w_out_ref[...],
                    preferred_element_type=jnp.float32)
        y = y + vec_ref[2 * n_hidden:2 * n_hidden + 1, :n_pad]
        o_ref[...] = y.astype(o_ref.dtype)

    return kernel


# ----------------------------- packing & wrapper --------------------------------

def _pack_params(params):
    """Pack PyTorch-style params into kernel inputs.

    params: [("linear_bn_relu", (W(in,out) f32, b, gamma, beta))]* +
            [("linear", (W(in,n_classes) f32, b))]
    Hidden biases are intentionally dropped (cancelled by training-mode BN).
    """
    hidden = [p for kind, p in params if kind == "linear_bn_relu"]
    w_out, b_out = [p for kind, p in params if kind == "linear"][0]

    n_hidden = len(hidden)
    fan_outs = tuple(int(w.shape[1]) for (w, _, _, _) in hidden)
    n_classes = int(w_out.shape[1])
    n_pad = _round_up(n_classes, _LANE)
    vwidth = max(n_pad, _round_up(max(fan_outs), _LANE))

    # One packed f32 array for all tiny vectors: gamma_i, beta_i, ..., b_out.
    vec = jnp.zeros((2 * n_hidden + 1, vwidth), jnp.float32)
    for i, (_, _, g, be) in enumerate(hidden):
        vec = vec.at[2 * i, :fan_outs[i]].set(g.reshape(-1).astype(jnp.float32))
        vec = vec.at[2 * i + 1, :fan_outs[i]].set(be.reshape(-1).astype(jnp.float32))
    vec = vec.at[2 * n_hidden, :n_classes].set(b_out.reshape(-1).astype(jnp.float32))

    # bf16 weights; final weight zero-padded to a lane-dense output width.
    w_hidden = tuple(w.astype(jnp.bfloat16) for (w, _, _, _) in hidden)
    w_out_pad = jnp.zeros((w_out.shape[0], n_pad), jnp.bfloat16)
    w_out_pad = w_out_pad.at[:, :n_classes].set(w_out.astype(jnp.bfloat16))

    return fan_outs, n_classes, n_pad, w_hidden, w_out_pad, vec


def make_mlp_forward(params):
    """Return a jitted forward. Layer structure is static (closure); only arrays
    cross the jit boundary."""
    fan_outs, n_classes, n_pad, w_hidden, w_out_pad, vec = _pack_params(params)
    n_hidden = len(fan_outs)
    kernel = _make_fused_mlp_kernel(fan_outs, n_pad)
    vmem = pl.BlockSpec(memory_space=pltpu.MemorySpace.VMEM)

    @jax.jit
    def fwd(x, *arrs):
        batch, in_dim = x.shape
        dims = (in_dim,) + fan_outs
        flops = 2 * batch * (sum(dims[i] * dims[i + 1] for i in range(n_hidden))
                             + fan_outs[-1] * n_pad)
        bytes_accessed = (x.size * x.dtype.itemsize
                          + sum(a.size * a.dtype.itemsize for a in arrs)
                          + batch * n_pad * 4)
        out_pad = pl.pallas_call(
            kernel,
            out_shape=jax.ShapeDtypeStruct((batch, n_pad), jnp.float32),
            in_specs=[vmem] * (1 + len(arrs)),
            out_specs=vmem,
            compiler_params=pltpu.CompilerParams(
                vmem_limit_bytes=32 * 1024 * 1024),
            cost_estimate=pl.CostEstimate(
                flops=flops,
                transcendentals=sum(fan_outs),      # one rsqrt per BN feature
                bytes_accessed=bytes_accessed),
        )(x, *arrs)
        return out_pad[:, :n_classes]               # slice padded lanes back off

    flat = (*w_hidden, w_out_pad, vec)
    return lambda x: fwd(x, *flat)


# --------------------------- parameter creation ----------------------------

def init_mlp_params(key, in_dim, n_classes, hidden_dims):
    """PyTorch-style init: Linear ~ U(-1/sqrt(fan_in), +1/sqrt(fan_in)).
    BN gamma/beta are randomized (instead of PyTorch's 1/0 default) purely so the
    affine path is exercised by the self-test; forward math is unchanged.
    Weights are stored transposed as (in, out), f32 (cast to bf16 when packed)."""
    assert len(hidden_dims) > 0
    params = []
    dims = [in_dim] + list(hidden_dims)
    for i in range(len(hidden_dims)):
        fan_in, fan_out = dims[i], dims[i + 1]
        key, kw, kb, kg, ke = jax.random.split(key, 5)
        bound = 1.0 / float(np_sqrt(fan_in))
        w = jax.random.uniform(kw, (fan_in, fan_out), jnp.float32, -bound, bound)
        b = jax.random.uniform(kb, (1, fan_out), jnp.float32, -bound, bound)
        gamma = jax.random.uniform(kg, (1, fan_out), jnp.float32, 0.5, 1.5)
        beta = jax.random.uniform(ke, (1, fan_out), jnp.float32, -0.5, 0.5)
        params.append(("linear_bn_relu", (w, b, gamma, beta)))
    fan_in = hidden_dims[-1]
    key, kw, kb = jax.random.split(key, 3)
    bound = 1.0 / float(np_sqrt(fan_in))
    w = jax.random.uniform(kw, (fan_in, n_classes), jnp.float32, -bound, bound)
    b = jax.random.uniform(kb, (1, n_classes), jnp.float32, -bound, bound)
    params.append(("linear", (w, b)))
    return params


def np_sqrt(v):
    return v ** 0.5


# Pure-JAX reference matching the PyTorch module in training mode.  It KEEPS the
# hidden-layer biases and the unfolded BN form; it uses the same bf16 matmul
# inputs as the kernel so the comparison is apples-to-apples on the MXU path.
def reference_mlp(x, params):
    h = x.astype(jnp.float32)
    for kind, p in params:
        if kind == "linear_bn_relu":
            w, b, g, be = p
            y = jnp.dot(h.astype(jnp.bfloat16), w.astype(jnp.bfloat16),
                        preferred_element_type=jnp.float32) + b
            mean = jnp.mean(y, axis=0, keepdims=True)
            var = jnp.mean((y - mean) ** 2, axis=0, keepdims=True)  # biased
            y = (y - mean) / jnp.sqrt(var + _BN_EPS) * g + be
            h = jnp.maximum(y, 0.0)
        else:
            w, b = p
            h = jnp.dot(h.astype(jnp.bfloat16), w.astype(jnp.bfloat16),
                        preferred_element_type=jnp.float32) + b
    return h


if __name__ == "__main__":
    # Small shapes consistent with the module: MLP(in_dim=16, n_classes=10,
    # hidden_dims=[32, 16]), batch of 8 samples.
    batch, in_dim, n_classes = 8, 16, 10
    hidden_dims = [32, 16]

    key = jax.random.PRNGKey(0)
    key, kx, kp = jax.random.split(key, 3)
    x = jax.random.normal(kx, (batch, in_dim), jnp.float32)
    params = init_mlp_params(kp, in_dim, n_classes, hidden_dims)

    forward = make_mlp_forward(params)
    out = jax.block_until_ready(forward(x))

    ref = reference_mlp(x, params)
    assert out.shape == (batch, n_classes), out.shape
    assert jnp.allclose(out, ref, atol=1e-4, rtol=1e-4), "mismatch vs reference"

    print("KERNEL_OK")
</pallas_src>

<mosaic_0001>
module attributes {stable_mosaic.version = 11 : i64} {
  func.func @kernel(%arg0: memref<8x16xf32, #tpu.memory_space<vmem>>, %arg1: memref<16x32xbf16, #tpu.memory_space<vmem>>, %arg2: memref<32x16xbf16, #tpu.memory_space<vmem>>, %arg3: memref<16x128xbf16, #tpu.memory_space<vmem>>, %arg4: memref<5x128xf32, #tpu.memory_space<vmem>>, %arg5: memref<8x128xf32, #tpu.memory_space<vmem>>) attributes {dimension_semantics = [], scalar_prefetch = 0 : i64, scratch_operands = 0 : i64, tpu.core_type = #tpu.core_type<tc>} {
    %c0 = arith.constant 0 : index
    %c0_0 = arith.constant 0 : index
    %0 = vector.load %arg0[%c0, %c0_0] : memref<8x16xf32, #tpu.memory_space<vmem>>, vector<8x16xf32>
    %1 = arith.truncf %0 : vector<8x16xf32> to vector<8x16xbf16>
    %c0_1 = arith.constant 0 : index
    %c0_2 = arith.constant 0 : index
    %2 = vector.load %arg1[%c0_1, %c0_2] : memref<16x32xbf16, #tpu.memory_space<vmem>>, vector<16x32xbf16>
    %cst = arith.constant dense<0.000000e+00> : vector<8x32xf32>
    %3 = tpu.matmul %1, %2, %cst {dimension_numbers = #tpu.dot_dimension_numbers<[1], [0], [0], [1], [0, 0, 1, 1], [], []>} : vector<8x16xbf16>, vector<16x32xbf16>, vector<8x32xf32> -> vector<8x32xf32>
    %cst_3 = arith.constant dense<0.000000e+00> : vector<32xf32>
    %4 = vector.multi_reduction <add>, %3, %cst_3 [0] : vector<8x32xf32> to vector<32xf32>
    %5 = vector.shape_cast %4 : vector<32xf32> to vector<1x32xf32>
    %cst_4 = arith.constant 8.000000e+00 : f32
    %6 = vector.broadcast %cst_4 : f32 to vector<1x32xf32>
    %7 = arith.divf %5, %6 : vector<1x32xf32>
    %8 = arith.mulf %3, %3 : vector<8x32xf32>
    %cst_5 = arith.constant dense<0.000000e+00> : vector<32xf32>
    %9 = vector.multi_reduction <add>, %8, %cst_5 [0] : vector<8x32xf32> to vector<32xf32>
    %10 = vector.shape_cast %9 : vector<32xf32> to vector<1x32xf32>
    %cst_6 = arith.constant 8.000000e+00 : f32
    %11 = vector.broadcast %cst_6 : f32 to vector<1x32xf32>
    %12 = arith.divf %10, %11 : vector<1x32xf32>
    %13 = arith.mulf %7, %7 : vector<1x32xf32>
    %14 = arith.subf %12, %13 : vector<1x32xf32>
    %cst_7 = arith.constant 0.000000e+00 : f32
    %15 = vector.broadcast %cst_7 : f32 to vector<1x32xf32>
    %16 = arith.maximumf %14, %15 : vector<1x32xf32>
    %c0_8 = arith.constant 0 : index
    %c0_9 = arith.constant 0 : index
    %17 = vector.load %arg4[%c0_8, %c0_9] : memref<5x128xf32, #tpu.memory_space<vmem>>, vector<1x32xf32>
    %c1 = arith.constant 1 : index
    %c0_10 = arith.constant 0 : index
    %18 = vector.load %arg4[%c1, %c0_10] : memref<5x128xf32, #tpu.memory_space<vmem>>, vector<1x32xf32>
    %cst_11 = arith.constant 9.99999974E-6 : f32
    %19 = vector.broadcast %cst_11 : f32 to vector<1x32xf32>
    %20 = arith.addf %16, %19 : vector<1x32xf32>
    %21 = math.rsqrt %20 : vector<1x32xf32>
    %22 = arith.mulf %17, %21 : vector<1x32xf32>
    %23 = arith.mulf %7, %22 : vector<1x32xf32>
    %24 = arith.subf %18, %23 : vector<1x32xf32>
    %25 = vector.broadcast %22 : vector<1x32xf32> to vector<8x32xf32>
    %26 = arith.mulf %3, %25 : vector<8x32xf32>
    %27 = vector.broadcast %24 : vector<1x32xf32> to vector<8x32xf32>
    %28 = arith.addf %26, %27 : vector<8x32xf32>
    %cst_12 = arith.constant 0.000000e+00 : f32
    %29 = vector.broadcast %cst_12 : f32 to vector<8x32xf32>
    %30 = arith.maximumf %28, %29 : vector<8x32xf32>
    %31 = arith.truncf %30 : vector<8x32xf32> to vector<8x32xbf16>
    %c0_13 = arith.constant 0 : index
    %c0_14 = arith.constant 0 : index
    %32 = vector.load %arg2[%c0_13, %c0_14] : memref<32x16xbf16, #tpu.memory_space<vmem>>, vector<32x16xbf16>
    %cst_15 = arith.constant dense<0.000000e+00> : vector<8x16xf32>
    %33 = tpu.matmul %31, %32, %cst_15 {dimension_numbers = #tpu.dot_dimension_numbers<[1], [0], [0], [1], [0, 0, 1, 1], [], []>} : vector<8x32xbf16>, vector<32x16xbf16>, vector<8x16xf32> -> vector<8x16xf32>
    %cst_16 = arith.constant dense<0.000000e+00> : vector<16xf32>
    %34 = vector.multi_reduction <add>, %33, %cst_16 [0] : vector<8x16xf32> to vector<16xf32>
    %35 = vector.shape_cast %34 : vector<16xf32> to vector<1x16xf32>
    %cst_17 = arith.constant 8.000000e+00 : f32
    %36 = vector.broadcast %cst_17 : f32 to vector<1x16xf32>
    %37 = arith.divf %35, %36 : vector<1x16xf32>
    %38 = arith.mulf %33, %33 : vector<8x16xf32>
    %cst_18 = arith.constant dense<0.000000e+00> : vector<16xf32>
    %39 = vector.multi_reduction <add>, %38, %cst_18 [0] : vector<8x16xf32> to vector<16xf32>
    %40 = vector.shape_cast %39 : vector<16xf32> to vector<1x16xf32>
    %cst_19 = arith.constant 8.000000e+00 : f32
    %41 = vector.broadcast %cst_19 : f32 to vector<1x16xf32>
    %42 = arith.divf %40, %41 : vector<1x16xf32>
    %43 = arith.mulf %37, %37 : vector<1x16xf32>
    %44 = arith.subf %42, %43 : vector<1x16xf32>
    %cst_20 = arith.constant 0.000000e+00 : f32
    %45 = vector.broadcast %cst_20 : f32 to vector<1x16xf32>
    %46 = arith.maximumf %44, %45 : vector<1x16xf32>
    %c2 = arith.constant 2 : index
    %c0_21 = arith.constant 0 : index
    %47 = vector.load %arg4[%c2, %c0_21] : memref<5x128xf32, #tpu.memory_space<vmem>>, vector<1x16xf32>
    %c3 = arith.constant 3 : index
    %c0_22 = arith.constant 0 : index
    %48 = vector.load %arg4[%c3, %c0_22] : memref<5x128xf32, #tpu.memory_space<vmem>>, vector<1x16xf32>
    %cst_23 = arith.constant 9.99999974E-6 : f32
    %49 = vector.broadcast %cst_23 : f32 to vector<1x16xf32>
    %50 = arith.addf %46, %49 : vector<1x16xf32>
    %51 = math.rsqrt %50 : vector<1x16xf32>
    %52 = arith.mulf %47, %51 : vector<1x16xf32>
    %53 = arith.mulf %37, %52 : vector<1x16xf32>
    %54 = arith.subf %48, %53 : vector<1x16xf32>
    %55 = vector.broadcast %52 : vector<1x16xf32> to vector<8x16xf32>
    %56 = arith.mulf %33, %55 : vector<8x16xf32>
    %57 = vector.broadcast %54 : vector<1x16xf32> to vector<8x16xf32>
    %58 = arith.addf %56, %57 : vector<8x16xf32>
    %cst_24 = arith.constant 0.000000e+00 : f32
    %59 = vector.broadcast %cst_24 : f32 to vector<8x16xf32>
    %60 = arith.maximumf %58, %59 : vector<8x16xf32>
    %61 = arith.truncf %60 : vector<8x16xf32> to vector<8x16xbf16>
    %c0_25 = arith.constant 0 : index
    %c0_26 = arith.constant 0 : index
    %62 = vector.load %arg3[%c0_25, %c0_26] : memref<16x128xbf16, #tpu.memory_space<vmem>>, vector<16x128xbf16>
    %cst_27 = arith.constant dense<0.000000e+00> : vector<8x128xf32>
    %63 = tpu.matmul %61, %62, %cst_27 {dimension_numbers = #tpu.dot_dimension_numbers<[1], [0], [0], [1], [0, 0, 1, 1], [], []>} : vector<8x16xbf16>, vector<16x128xbf16>, vector<8x128xf32> -> vector<8x128xf32>
    %c4 = arith.constant 4 : index
    %c0_28 = arith.constant 0 : index
    %64 = vector.load %arg4[%c4, %c0_28] : memref<5x128xf32, #tpu.memory_space<vmem>>, vector<1x128xf32>
    %65 = vector.broadcast %64 : vector<1x128xf32> to vector<8x128xf32>
    %66 = arith.addf %63, %65 : vector<8x128xf32>
    %c0_29 = arith.constant 0 : index
    %c0_30 = arith.constant 0 : index
    %67 = vector.load %arg5[%c0_29, %c0_30] : memref<8x128xf32, #tpu.memory_space<vmem>>, vector<8x128xf32>
    tpu.vector_store %arg5[%c0_29, %c0_30], %66 {strides = array<i32>} : memref<8x128xf32, #tpu.memory_space<vmem>>, vector<8x128xf32>,
    return
  }
}

</mosaic_0001>

<bundles_post_ra>
// kernel: fwd.1
= control target key start
LH: loop header
LB: loop body
LE: loop exit
PB: predicated region body
PF: predicated region fallthrough
CT: control target
= control target key end

     0   :  { %10 = vsyncpa [#allocation3], 0  ;;  %s377_s0 = inlined_call_operand.vmem [shape: f32[8,16], index: 0, kind: input, shape index: {}]   ;;  %s378_s1 = inlined_call_operand.vmem [shape: bf16[16,32], index: 1, kind: input, shape index: {}]   ;;  %s379_s2 = inlined_call_operand.vmem [shape: bf16[32,16], index: 2, kind: input, shape index: {}]   ;;  %s380_s3 = inlined_call_operand.vmem [shape: bf16[16,128], index: 3, kind: input, shape index: {}]   ;;  %s381_s4 = inlined_call_operand.hbm [shape: f32[5,128], index: 4, kind: input, shape index: {}]   ;;  %s382_s5 = inlined_call_operand.hbm [shape: f32[8,128], index: 5, kind: output, shape index: {}]  }
   0x1   :  { %11 = vsyncpa [#allocation4], 0  ;;  %s25_s20 = sshll.u32 %s381_s4, 4  ;;  %s316_s21 = smov [#allocation2]   ;;  %s26_s20 = int_to_ptr.hbm [resolvable:$true] %s25_s20 }
   0x2   :  { %s27_s22 = sshll.u32 %s316_s21, 4  ;;  %s28_s22 = int_to_ptr.vmem [resolvable:$true] %s27_s22 }
   0x3   :  { %30 = dma.hbm_to_vmem [thread:$0]  %s26_s20, 128, %s28_s22, [#allocation3]  }
   0x4   :  { %312 = dma.done.wait [#allocation3], 128  }
   0x5   :  { %313 = vsyncadd [#allocation3], 4294967168  ;;  %v250_v0 = vld [vmem:[%s378_s1] sm:$0xff]  ;;  %vm46_vm0 = vcmask 130048   ;;  %v252_v3 = vld [vmem:[%s379_s2 + $0x8] sm:$0xff]  ;;  %v317_v5 = vmov 8.0  }
   0x6   :  { %v36_v1 = vld [vmem:[%s377_s0] sm:$0xff]  ;;  %57 = vmatpush.bf16.msra.mxu0 %v250_v0  ;;  %138 = vmatpush.bf16.msra.mxu1 %v252_v3  ;;  %258 = vrcp.f32 %v317_v5  ;;  %vm63_vm1 = vcmask 261120   ;;  %s221_s7 = sshll.u32 %s382_s5, 4  ;;  %s222_s7 = int_to_ptr.hbm [resolvable:$true] %s221_s7 }
   0x7   :  { %v37_v2 = vpack.c.bf16 %v36_v1, %v36_v1  ;;  %v251_v4 = vld [vmem:[%s379_s2] sm:$0xff]  ;;  %s318_s2 = smov [#allocation5]  }
   0x8   :  { %v91_v40 = vld [vmem:[#allocation2] sm:$0x1]  ;;  %v92_v44 = vld [vmem:[#allocation2 + $0x1] sm:$0x1] }
   0x9   :  { %235 = vmatmul.msk.bf16.vlgmr.msra.gmra.mxu0 %vm46_vm0, %v37_v2 }
   0xa   :  { %139 = vmatpush.bf16.msra.mxu1 %v251_v4 }
   0xc   :  { %v259_v6 = vpop.eup %258 }
   0xd   :  { %v72_v7 = vmul.f32 8.0, %v259_v6  ;;  %vm76_vm2 = vweird.f32 %v259_v6 }
   0xf   :  { %v73_v8 = vsub.f32 1.0, %v72_v7  ;;  %v253_v7 = vld [vmem:[%s380_s3] sm:$0xff]  ;;  %s219_s3 = sshll.u32 %s318_s2, 4  ;;  %s220_s3 = int_to_ptr.vmem [resolvable:$true] %s219_s3 }
  0x10   :  { %207 = vmatpush.bf16.msra.mxu2 %v253_v7 }
  0x11   :  { %v74_v13 = vmul.f32 %v259_v6, %v73_v8 }
  0x13   :  { %v75_v19 = vadd.f32 %v259_v6, %v74_v13 }
  0x15   :  { %v77_v25 = vsel %vm76_vm2, %v259_v6, %v75_v19 }
  0x86   :  { %v59_v9 = vpop.f32.mrf.mxu0 }
  0x87   :  { %v79_v10 = vmul.f32 %v59_v9, %v59_v9  ;;  %v64_v11 = vsel %vm63_vm1, %v59_v9, 0.0 }
  0x88   :  { %v65_v12 = vrot.slane %v64_v11, 4 }
  0x89   :  { %v80_v14 = vsel %vm63_vm1, %v79_v10, 0.0 }
  0x8a   :  { %v66_v15 = vadd.f32 %v65_v12, %v64_v11  ;;  %v81_v16 = vrot.slane %v80_v14, 4 }
  0x8c   :  { %v67_v17 = vrot.slane %v66_v15, 2  ;;  %v82_v18 = vadd.f32 %v81_v16, %v80_v14 }
  0x8e   :  { %v61_v20 = vpop.f32.mrf.mxu0  ;;  %v68_v21 = vadd.f32 %v67_v17, %v66_v15  ;;  %v83_v22 = vrot.slane %v82_v18, 2 }
  0x90   :  { %v69_v23 = vrot.slane %v68_v21, 1  ;;  %v84_v24 = vadd.f32 %v83_v22, %v82_v18  ;;  %v165_v18 = vld [vmem:[#allocation2 + $0x2] sm:$0x1]  ;;  %v166_v22 = vld [vmem:[#allocation2 + $0x3] sm:$0x1] }
  0x92   :  { %v70_v26 = vadd.f32 %v69_v23, %v68_v21  ;;  %v85_v27 = vrot.slane %v84_v24, 1 }
  0x94   :  { %v78_v28 = vmul.f32 %v77_v25, %v70_v26  ;;  %v86_v29 = vadd.f32 %v85_v27, %v84_v24 }
  0x96   :  { %v87_v30 = vmul.f32 %v86_v29, %v77_v25  ;;  %v88_v31 = vmul.f32 %v78_v28, %v78_v28 }
  0x98   :  { %v89_v32 = vsub.f32 %v87_v30, %v88_v31  ;;  %v257_v31 = vld [vmem:[#allocation2 + $0x4] ss:$0 sm:$0xff] }
  0x9a   :  { %v90_v33 = vmax.f32 %v89_v32, 0.0 }
  0x9c   :  { %v93_v34 = vadd.f32 1e-05, %v90_v33 }
  0x9e   :  { %260 = vrsqrt.f32 %v93_v34  ;;  %vm100_vm4 = vweird.f32 %v93_v34 }
  0xa4   :  { %v261_v35 = vpop.eup %260 }
  0xa5   :  { %v95_v36 = vmul.f32 %v261_v35, %v93_v34  ;;  %vm101_vm3 = vweird.f32 %v261_v35 }
  0xa6   :  { %vm102_vm5 = vmor %vm100_vm4, %vm101_vm3 }
  0xa7   :  { %v96_v37 = vmul.f32 %v261_v35, %v95_v36 }
  0xa9   :  { %v97_v38 = vmul.f32 0.5, %v96_v37 }
  0xab   :  { %v98_v39 = vsub.f32 1.5, %v97_v38 }
  0xad   :  { %v99_v41 = vmul.f32 %v261_v35, %v98_v39 }
  0xaf   :  { %v103_v42 = vsel %vm102_vm5, %v261_v35, %v99_v41 }
  0xb0   :  { %v104_v43 = vmul.f32 %v103_v42, %v91_v40 }
  0xb2   :  { %v105_v45 = vmul.f32 %v104_v43, %v78_v28  ;;  %v107_v46 = vperm.slane %v104_v43, 0 }
  0xb4   :  { %v106_v47 = vsub.f32 %v92_v44, %v105_v45  ;;  %v108_v48 = vmul.f32 %v107_v46, %v59_v9 }
  0xb6   :  { %v109_v49 = vperm.slane %v106_v47, 0 }
  0xb8   :  { %v110_v50 = vadd.f32 %v109_v49, %v108_v48 }
  0xba   :  { %v111_v51 = vmax.f32 %v110_v50, 0.0 }
  0xbc   :  { %v112_v52 = vpack.c.bf16 %v111_v51, %v111_v51 }
  0xbe   :  { %244 = vmatmul.msk.bf16.vlgmr.msra.gmra.mxu1 %vm63_vm1, %v112_v52 }
 0x13b   :  { %v141_v53 = vpop.f32.mrf.mxu1 }
 0x13c   :  { %v145_v54 = vsel %vm46_vm0, %v141_v53, 0.0  ;;  %v153_v55 = vmul.f32 %v141_v53, %v141_v53 }
 0x13d   :  { %v146_v56 = vrot.slane %v145_v54, 4 }
 0x13e   :  { %v154_v57 = vsel %vm46_vm0, %v153_v55, 0.0 }
 0x13f   :  { %v147_v58 = vadd.f32 %v146_v56, %v145_v54  ;;  %v155_v59 = vrot.slane %v154_v57, 4 }
 0x141   :  { %v148_v60 = vrot.slane %v147_v58, 2  ;;  %v156_v61 = vadd.f32 %v155_v59, %v154_v57 }
 0x143   :  { %v149_v62 = vadd.f32 %v148_v60, %v147_v58  ;;  %v157_v63 = vrot.slane %v156_v61, 2  ;;  %v143_v0 = vpop.f32.mrf.mxu1 }
 0x145   :  { %v150_v1 = vrot.slane %v149_v62, 1  ;;  %v158_v2 = vadd.f32 %v157_v63, %v156_v61 }
 0x147   :  { %v151_v3 = vadd.f32 %v150_v1, %v149_v62  ;;  %v159_v4 = vrot.slane %v158_v2, 1 }
 0x149   :  { %v152_v5 = vmul.f32 %v151_v3, %v77_v25  ;;  %v160_v6 = vadd.f32 %v159_v4, %v158_v2 }
 0x14b   :  { %v161_v8 = vmul.f32 %v160_v6, %v77_v25  ;;  %v162_v9 = vmul.f32 %v152_v5, %v152_v5 }
 0x14d   :  { %v163_v10 = vsub.f32 %v161_v8, %v162_v9 }
 0x14f   :  { %v164_v11 = vmax.f32 %v163_v10, 0.0 }
 0x151   :  { %v167_v12 = vadd.f32 1e-05, %v164_v11 }
 0x153   :  { %262 = vrsqrt.f32 %v167_v12  ;;  %vm174_vm7 = vweird.f32 %v167_v12 }
 0x159   :  { %v263_v13 = vpop.eup %262 }
 0x15a   :  { %v169_v14 = vmul.f32 %v263_v13, %v167_v12  ;;  %vm175_vm6 = vweird.f32 %v263_v13 }
 0x15b   :  { %vm176_vm8 = vmor %vm174_vm7, %vm175_vm6 }
 0x15c   :  { %v170_v15 = vmul.f32 %v263_v13, %v169_v14 }
 0x15e   :  { %v171_v16 = vmul.f32 0.5, %v170_v15 }
 0x160   :  { %v172_v17 = vsub.f32 1.5, %v171_v16 }
 0x162   :  { %v173_v19 = vmul.f32 %v263_v13, %v172_v17 }
 0x164   :  { %v177_v20 = vsel %vm176_vm8, %v263_v13, %v173_v19 }
 0x165   :  { %v178_v21 = vmul.f32 %v177_v20, %v165_v18 }
 0x167   :  { %v181_v23 = vperm.slane %v178_v21, 0  ;;  %v179_v24 = vmul.f32 %v178_v21, %v152_v5 }
 0x169   :  { %v180_v25 = vsub.f32 %v166_v22, %v179_v24  ;;  %v182_v26 = vmul.f32 %v181_v23, %v141_v53 }
 0x16b   :  { %v183_v27 = vperm.slane %v180_v25, 0 }
 0x16d   :  { %v184_v28 = vadd.f32 %v183_v27, %v182_v26 }
 0x16f   :  { %v185_v29 = vmax.f32 %v184_v28, 0.0 }
 0x171   :  { %v186_v30 = vpack.c.bf16 %v185_v29, %v185_v29 }
 0x173   :  { %249 = vmatmul.msk.bf16.vlgmr.msra.gmra.mxu2 %vm46_vm0, %v186_v30 }
 0x1f6   :  { %v209_v32 = vpop.f32.mrf.mxu2 }
 0x1f7   :  { %v210_v33 = vadd.f32 %v257_v31, %v209_v32 }
 0x1f9   :  { %213 = vst [vmem:[#allocation5] sm:$0xff] %v210_v33 }
 0x1fa   :  { %224 = dma.vmem_to_hbm [thread:$0]  %s220_s3, 128, %s222_s7, [#allocation4]  }
 0x1fe   :  { %v211_v34 = vpop.f32.mrf.mxu2 }
 0x1ff   :  { %314 = dma.done.wait [#allocation4], 128  }
 0x200   :  { %315 = vsyncadd [#allocation4], 4294967168 }
 0x201   :  { %229 = vsyncpa [#allocation3], 1 }
 0x202   :  { %230 = vsyncpa [#allocation4], 1 }

</bundles_post_ra>
